<compile_context>
chip_gen: v7x
topology: tpu7x:2x2x1
jax: 0.10.0
libtpu: 0.0.40
codegen_flags: <defaults>
</compile_context>

<pallas_src>
import functools

import jax
import jax.numpy as jnp
from jax.experimental import pallas as pl
from jax.experimental.pallas import tpu as pltpu


def _round_up(x: int, m: int) -> int:
    return (x + m - 1) // m * m


def _pick_tile(total: int, max_tile: int, align: int = 8) -> int:
    """Sublane-aligned row tile; prefers >=2 grid steps for 2-TC sharding.

    NOTE: align must be 16 if inputs ever switch to bf16 ((16,128) tiling).
    """
    t = min(max_tile, _round_up(total, align))
    if t >= total and total > align:
        t = _round_up((total + 1) // 2, align)   # split so both v7x TCs get work
    return max(t, align)


# ---------------------------------------------------------------------------
# Kernel 1: row-wise L2 normalization of the entity embedding table
# (matches `entities_emb.data / torch.norm(entities_emb, p=2, dim=1).view(-1,1)`)
# ---------------------------------------------------------------------------
def _l2_normalize_kernel(e_ref, o_ref):
    e = e_ref[...].astype(jnp.float32)
    sumsq = jnp.sum(e * e, axis=1, keepdims=True)
    inv = jax.lax.rsqrt(jnp.maximum(sumsq, 1e-30))   # EUP; avoids 0-row NaN
    o_ref[...] = (e * inv).astype(o_ref.dtype)


def l2_normalize_rows(emb, row_tile: int = 8192):
    n, d = emb.shape
    tm = _pick_tile(n, row_tile)
    return pl.pallas_call(
        _l2_normalize_kernel,
        out_shape=jax.ShapeDtypeStruct((n, d), emb.dtype),
        grid=(pl.cdiv(n, tm),),
        in_specs=[pl.BlockSpec((tm, d), lambda i: (i, 0))],
        out_specs=pl.BlockSpec((tm, d), lambda i: (i, 0)),
        compiler_params=pltpu.CompilerParams(
            dimension_semantics=("parallel",),
            vmem_limit_bytes=40 << 20),
    )(emb)


# ---------------------------------------------------------------------------
# Kernel 2: per-triplet margin hinge on batch tiles.
# Heads / tails arrive as RAW entity rows and are L2-normalized in-kernel
# (row-wise, so identical to gathering from the renormalized table).
#   pd = ||norm(h_p) + r_p - norm(t_p)||_p
#   nd = ||norm(h_n) + r_n - norm(t_n)||_p
#   out = max(pd - nd + margin, 0)      -- written as (tb, 1)
# ---------------------------------------------------------------------------
def _transe_loss_kernel(hp_ref, rp_ref, tp_ref, hn_ref, rn_ref, tn_ref, o_ref,
                        *, norm, margin):
    def row_l2n(ref):
        x = ref[...].astype(jnp.float32)
        inv = jax.lax.rsqrt(jnp.maximum(jnp.sum(x * x, axis=1, keepdims=True),
                                        1e-30))
        return x * inv

    def dist(h, r_ref, t):
        dd = h + r_ref[...].astype(jnp.float32) - t
        if norm == 1:
            return jnp.sum(jnp.abs(dd), axis=1, keepdims=True)
        return jnp.sqrt(jnp.sum(dd * dd, axis=1, keepdims=True))

    pd = dist(row_l2n(hp_ref), rp_ref, row_l2n(tp_ref))
    nd = dist(row_l2n(hn_ref), rn_ref, row_l2n(tn_ref))
    o_ref[...] = jnp.maximum(pd - nd + margin, 0.0)


def transe_forward(entities_emb, rel_emb, pos_triplets, neg_triplets,
                   norm=1, margin=1.0, batch_tile=2048, row_tile=8192):
    """Returns (loss[B], renormalized entity table) mirroring Model.forward."""
    # Side effect of Model.forward: the entity table is L2-renormalized.
    # (input_output_aliases={0:0} would mirror the in-place .data update, but
    #  the raw table is still consumed by the gather below, so we skip it.)
    ent_norm = l2_normalize_rows(entities_emb, row_tile=row_tile)

    # Gather RAW rows (glue; plain-JAX indexing).  The loss kernel normalizes
    # head/tail rows itself, so this path does not wait on the table kernel.
    hp = entities_emb[pos_triplets[:, 0]]
    rp = rel_emb[pos_triplets[:, 1]]
    tp = entities_emb[pos_triplets[:, 2]]
    hn = entities_emb[neg_triplets[:, 0]]
    rn = rel_emb[neg_triplets[:, 1]]
    tn = entities_emb[neg_triplets[:, 2]]

    B, d = hp.shape
    tb = _pick_tile(B, batch_tile)

    kernel = functools.partial(_transe_loss_kernel, norm=norm,
                               margin=float(margin))
    out = pl.pallas_call(
        kernel,
        out_shape=jax.ShapeDtypeStruct((B, 1), jnp.float32),
        grid=(pl.cdiv(B, tb),),
        in_specs=[pl.BlockSpec((tb, d), lambda i: (i, 0))] * 6,
        out_specs=pl.BlockSpec((tb, 1), lambda i: (i, 0)),
        compiler_params=pltpu.CompilerParams(
            dimension_semantics=("parallel",),
            vmem_limit_bytes=40 << 20),
    )(hp, rp, tp, hn, rn, tn)
    return out[:, 0], ent_norm


# ---------------------------------------------------------------------------
# Parameter init (deterministic; mirrors reset_parameters())
# ---------------------------------------------------------------------------
def init_params(key, entity_count, relation_count, dim, dtype=jnp.float32):
    k1, k2 = jax.random.split(key)
    ur = 6.0 / jnp.sqrt(jnp.float32(dim))
    ent = jax.random.uniform(k1, (entity_count, dim), dtype, -ur, ur)
    rel = jax.random.uniform(k2, (relation_count, dim), dtype, -ur, ur)
    rel = rel / jnp.sum(jnp.abs(rel), axis=1, keepdims=True)  # L1 row-normalize
    return ent, rel


if __name__ == "__main__":
    entity_count, relation_count, dim = 32, 8, 50
    batch, norm, margin = 8, 1, 1.0

    key = jax.random.PRNGKey(0)
    kp, kn, ke = jax.random.split(key, 3)
    entities_emb, rel_emb = init_params(ke, entity_count, relation_count, dim)

    pos = jnp.stack([
        jax.random.randint(jax.random.fold_in(kp, 0), (batch,), 0, entity_count),
        jax.random.randint(jax.random.fold_in(kp, 1), (batch,), 0, relation_count),
        jax.random.randint(jax.random.fold_in(kp, 2), (batch,), 0, entity_count),
    ], axis=1).astype(jnp.int32)
    neg = jnp.stack([
        jax.random.randint(jax.random.fold_in(kn, 0), (batch,), 0, entity_count),
        jax.random.randint(jax.random.fold_in(kn, 1), (batch,), 0, relation_count),
        jax.random.randint(jax.random.fold_in(kn, 2), (batch,), 0, entity_count),
    ], axis=1).astype(jnp.int32)

    loss, ent_norm = transe_forward(entities_emb, rel_emb, pos, neg,
                                    norm=norm, margin=margin)
    loss = jax.block_until_ready(loss)
    ent_norm = jax.block_until_ready(ent_norm)

    # Pure-JAX reference check.
    ent_ref = entities_emb / jnp.linalg.norm(entities_emb, axis=1, keepdims=True)

    def dist_ref(trip):
        dd = ent_ref[trip[:, 0]] + rel_emb[trip[:, 1]] - ent_ref[trip[:, 2]]
        return jnp.sum(jnp.abs(dd), axis=1) if norm == 1 else jnp.linalg.norm(dd, axis=1)

    ref = jnp.maximum(dist_ref(pos) - dist_ref(neg) + margin, 0.0)

    assert loss.shape == (batch,)
    assert ent_norm.shape == entities_emb.shape
    assert jnp.allclose(ent_norm, ent_ref, atol=1e-4, rtol=1e-4)
    assert jnp.allclose(loss, ref, atol=1e-4, rtol=1e-4), (loss, ref)
    print("KERNEL_OK")
</pallas_src>

<mosaic_0001>
module attributes {stable_mosaic.version = 11 : i64} {
  func.func @_l2_normalize_kernel(%arg0: i32, %arg1: memref<16x50xf32, #tpu.memory_space<vmem>>, %arg2: memref<16x50xf32, #tpu.memory_space<vmem>>) attributes {dimension_semantics = [#tpu.dimension_semantics<parallel>], iteration_bounds = array<i64: 2>, scalar_prefetch = 0 : i64, scratch_operands = 0 : i64, tpu.core_type = #tpu.core_type<tc>, window_params = [{transform_indices = @transform_0, window_bounds = array<i64: 16, 50>}, {transform_indices = @transform_1, window_bounds = array<i64: 16, 50>}]} {
    %c0 = arith.constant 0 : index
    %c0_0 = arith.constant 0 : index
    %0 = vector.load %arg1[%c0, %c0_0] : memref<16x50xf32, #tpu.memory_space<vmem>>, vector<16x50xf32>
    %1 = arith.mulf %0, %0 : vector<16x50xf32>
    %cst = arith.constant dense<0.000000e+00> : vector<16xf32>
    %2 = vector.multi_reduction <add>, %1, %cst [1] : vector<16x50xf32> to vector<16xf32>
    %3 = vector.shape_cast %2 : vector<16xf32> to vector<16x1xf32>
    %cst_1 = arith.constant 1.000000e-30 : f32
    %4 = vector.broadcast %cst_1 : f32 to vector<16x1xf32>
    %5 = arith.maximumf %3, %4 : vector<16x1xf32>
    %6 = math.rsqrt %5 : vector<16x1xf32>
    %7 = vector.broadcast %6 : vector<16x1xf32> to vector<16x50xf32>
    %8 = arith.mulf %0, %7 : vector<16x50xf32>
    %c0_2 = arith.constant 0 : index
    %c0_3 = arith.constant 0 : index
    %9 = vector.load %arg2[%c0_2, %c0_3] : memref<16x50xf32, #tpu.memory_space<vmem>>, vector<16x50xf32>
    tpu.vector_store %arg2[%c0_2, %c0_3], %8 {strides = array<i32>} : memref<16x50xf32, #tpu.memory_space<vmem>>, vector<16x50xf32>,
    return
  }
  func.func @transform_0(%arg0: i32) -> (i32, i32) {
    %c0_i32 = arith.constant 0 : i32
    %c0_i32_0 = arith.constant 0 : i32
    return %arg0, %c0_i32 : i32, i32
  }
  func.func @transform_1(%arg0: i32) -> (i32, i32) {
    %c0_i32 = arith.constant 0 : i32
    %c0_i32_0 = arith.constant 0 : i32
    return %arg0, %c0_i32 : i32, i32
  }
}

</mosaic_0001>

<bundles_post_ra>
// kernel: tpu_custom_call.1
= control target key start
LH: loop header
LB: loop body
LE: loop exit
PB: predicated region body
PF: predicated region fallthrough
CT: control target
= control target key end

     0   :  { %6 = vsyncpa [#allocation3], 0  ;;  %s593_s0 = inlined_call_operand.hbm [shape: f32[32,50], index: 0, kind: input, shape index: {}]   ;;  %s594_s1 = inlined_call_operand.hbm [shape: f32[32,50], index: 1, kind: output, shape index: {}]  }
   0x1   :  { %8 = vsyncpa [#allocation3 + $0x1], 0 }
   0x2   :  { %9 = vsyncpa [#allocation4], 0 }
   0x3   :  { %11 = vsyncpa [#allocation4 + $0x1], 0  ;;  %s427_s6 = smov 0   ;;  %s429_s7 = smov 0  }
   0x4   :  { %s431_s8 = smov 0   ;;  %s433_s9 = smov 0  }
   0x5 LB: > { %s448_s10 = sadd.s32 4294967295, %s409_s9   ;;  %s243_s11 = sadd.s32 4294967294, %s409_s9   ;;  %s409_s9 = sphi %s433_s9, %s607_s9   ;;  %s405_s8 = sphi %s431_s8, %s606_s8   ;;  %s401_s7 = sphi %s429_s7, %s605_s7   ;;  %s397_s6 = sphi %s427_s6, %s604_s6  }
   0x6   : > { %s452_s12 = sadd.s32 1, %s409_s9   ;;  %s24_s13 = sadd.s32 1, %s405_s8 }
   0x7   : > { %s21_s14 = ssub.s32 %s409_s9, %s452_s12  ;;  %p31_p0 = scmp.ne.s32.totalorder %s405_s8, %s401_s7 }
   0x8   : > { %p22_p1 = scmp.eq.s32.totalorder %s21_s14, 0  ;;  %p32_p2 = scmp.eq.s32.totalorder %s409_s9, 0 }
   0x9   : > { %p37_p3 = scmp.ne.s32.totalorder %s401_s7, %s397_s6  ;;  %p38_p4 = scmp.eq.s32.totalorder %s448_s10, 0 }
   0xa   : > { %s464_s15 = scalar_select %p22_p1, %s405_s8, %s24_s13  }
   0xb   : > { %p466_p5 = por %p32_p2, %p31_p0  ;;  %p470_p6 = por %p38_p4, %p37_p3 }
   0xc   : > { %p61_p7 = scmp.eq.s32.totalorder %s448_s10, 1  ;;  %p67_p8 = scmp.eq.s32.totalorder %s243_s11, 1 }
   0xd   : > { %p271_p10 = scmp.lt.s32.totalorder %s409_s9, 2  ;;  %s87_s20 = sand.u32 1, %s405_s8  }
   0xe   : > { %p477_p11 = por %p61_p7, %p31_p0  ;;  %p481_p12 = por %p67_p8, %p37_p3 }
   0xf   : > { %s257_s21 = sshll.u32 %s409_s9, 8  ;;  %s246_s22 = sshll.u32 %s87_s20, 4 }
  0x10   : > { %s598_s18 = scalar_select %p477_p11, 1, 0 }
  0x11   : > { %s599_s19 = scalar_select %p481_p12, 1, 0 }
  0x12   : > { %s490_s25 = scalar_lea.hbm %s593_s0, %s257_s21  ;;  %s91_s26 = scalar_lea.vmem [#allocation2], %s246_s22 }
  0x13   : > { %s98_s27 = sshll.u32 %s91_s26, 4  ;;  %p494_p13 = pnand %p271_p10, %p466_p5  ;;  %s498_s27 = int_to_ptr.vmem [resolvable:$true] %s98_s27 }
  0x14   : > { %s500_s29 = scalar_lea.sflag [#allocation3], %s87_s20  ;;  %s313_s30 = scalar_lea.hbm %s490_s25, 256 }
  0x15   : > { %p314_p0 = scmp.ne.s32.totalorder %s490_s25, %s313_s30  ;;  %p315_p1 = pneg %p494_p13 }
  0x16   : > { %s318_s4 = scalar_lea.hbm %s593_s0, 512  ;;  %p319_p4 = scmp.lt.u32.totalorder %s490_s25, %s593_s0 }
  0x17   : > { %p316_p2 = pnand %p315_p1, %p314_p0  ;;  %p320_p5 = scmp.lt.u32.totalorder %s318_s4, %s313_s30 }
  0x18   : > { %p322_p8 = scmp.lt.u32.totalorder %s313_s30, %s490_s25 }
  0x19   : > { %p317_p3 = pneg %p316_p2  ;;  %p321_p7 = por %p320_p5, %p319_p4 }
  0x1b   : > { %p323_p10 = por %p322_p8, %p321_p7 }
  0x1d   : > { %p324_p9 = pnand %p323_p10, %p317_p3 }
  0x1f   : > { %327 = shalt.err (!%p324_p9)
}
  0x20   : > { %s328_s13 = scalar_lea.vmem %s498_s27, 256  ;;  %s411_s14 = smov [#allocation2]  }
  0x21   : > { %p329_p0 = scmp.ne.s32.totalorder %s498_s27, %s328_s13  ;;  %s333_s16 = sshll.u32 %s411_s14, 4  ;;  %s334_s16 = int_to_ptr.vmem [resolvable:$false] %s333_s16 }
  0x22   : > { %s335_s20 = scalar_lea.vmem %s334_s16, 512  ;;  %p336_p11 = scmp.lt.s32.totalorder %s498_s27, %s334_s16 }
  0x23   : > { %p331_p2 = pnand %p329_p0, %p315_p1  ;;  %p337_p4 = scmp.lt.s32.totalorder %s335_s20, %s328_s13 }
  0x25   : > { %p332_p12 = pneg %p331_p2  ;;  %p338_p5 = por %p337_p4, %p336_p11 }
  0x27   : > { %p339_p7 = pnand %p338_p5, %p332_p12 }
  0x29   : > { %342 = shalt.err (!%p339_p7)
}
  0x2a   : > { %s412_s21 = smov 128   ;;  %s413_s22 = smov 8  }
  0x2b   : > { %266 = dma.hbm_to_vmem [thread:$0]  (!%p494_p13), %s490_s25, 256, %s498_s27, %s500_s29, %s412_s21, %s412_s21, %s413_s22  }
  0x2c   : > { %p249_p9 = scmp.ge.s32.totalorder %s409_s9, 1  ;;  %p106_p1 = scmp.lt.s32.totalorder %s409_s9, 3 }
  0x2e   : > { %p107_p3 = pnand %p249_p9, %p106_p1 }
  0x2f   : > { %s531_s23 = sand.u32 (!%p107_p3), 1, %s401_s7  }
  0x30   : > { %110 = sbr.rel (%p107_p3) target bundleno = 236 (0xec), region = 24  ;;  %s250_s24 = sshll.u32 (!%p107_p3), %s531_s23, 4 }
  0x31   : > { %s113_s26 = scalar_lea.sflag (!%p107_p3), [#allocation3], %s531_s23  ;;  %s116_s30 = scalar_lea.vmem (!%p107_p3), [#allocation2], %s250_s24 }
  0x37   : > { %388 = dma.done.wait (%p470_p6), %s113_s26, 256  }
  0x38   : > { %390 = vsyncadd (%p470_p6), %s113_s26, 4294967040  ;;  %v137_v0 = vld [vmem:[%s116_s30] sm:$0xff]  ;;  %vm141_vm0 = vcmask 408576   ;;  %v138_v1 = vld [vmem:[%s116_s30 + $0x8] sm:$0xff]  ;;  %s258_s17 = sshll.u32 %s448_s10, 8  ;;  %s134_s25 = scalar_lea.vmem [#allocation5], %s250_s24 }
  0x39   : > { %v139_v2 = vmul.f32 %v137_v0, %v137_v0  ;;  %v140_v3 = vmul.f32 %v138_v1, %v138_v1  ;;  %s170_s27 = sshll.u32 %s134_s25, 4  ;;  %s546_s2 = scalar_lea.hbm %s594_s1, %s258_s17  ;;  %s548_s27 = int_to_ptr.vmem [resolvable:$true] %s170_s27 }
  0x3a   : > { %s157_s3 = scalar_lea.sflag [#allocation4], %s531_s23  ;;  %s343_s10 = scalar_lea.vmem %s548_s27, 256 }
  0x3b   : > { %v142_v4 = vsel %vm141_vm0, %v139_v2, 0.0  ;;  %v145_v5 = vsel %vm141_vm0, %v140_v3, 0.0  ;;  %p344_p6 = scmp.ne.s32.totalorder %s548_s27, %s343_s10  ;;  %p601_p11 = scmp.ne.s32.totalorder %s598_s18, 0 }
  0x3c   : > { %143 = vadd.xlane.f32.xlu0 %v142_v4  ;;  %s414_s4 = smov [#allocation5]  }
  0x3d   : > { %p345_p12 = pnand %p344_p6, %p601_p11  ;;  %s347_s5 = sshll.u32 %s414_s4, 4  ;;  %s348_s5 = int_to_ptr.vmem [resolvable:$false] %s347_s5 }
  0x3e   : > { %s349_s11 = scalar_lea.vmem %s348_s5, 512  ;;  %p350_p8 = scmp.lt.s32.totalorder %s548_s27, %s348_s5 }
  0x3f   : > { %p346_p13 = pneg %p345_p12  ;;  %p351_p10 = scmp.lt.s32.totalorder %s349_s11, %s343_s10 }
  0x40   : > { %146 = vadd.xlane.f32.xlu0 %v145_v5 }
  0x41   : > { %p352_p0 = por %p351_p10, %p350_p8 }
  0x43   : > { %p353_p2 = pnand %p352_p0, %p346_p13 }
  0xc9   : > { %v144_v6 = vpop.xlane.xlu0 %143 }
  0xca   : > { %v148_v7 = vmax.f32 %v144_v6, 1e-30 }
  0xcc   : > { %309 = vrsqrt.f32 %v148_v7 }
  0xcd   : > { %v147_v8 = vpop.xlane.xlu0 %146 }
  0xce   : > { %v149_v9 = vmax.f32 %v147_v8, 1e-30 }
  0xd0   : > { %311 = vrsqrt.f32 %v149_v9 }
  0xd6   : > { %v310_v10 = vpop.eup %309 }
  0xd7   : > { %v152_v11 = vmul.f32 %v310_v10, %v137_v0 }
  0xd9   : > { %154 = vst.msk [vmem:[%s134_s25] sm:$0xff] %vm141_vm0, %v152_v11 }
  0xda   : > { %v312_v12 = vpop.eup %311 }
  0xdb   : > { %v153_v13 = vmul.f32 %v312_v12, %v138_v1 }
  0xdd   : > { %155 = vst.msk [vmem:[%s134_s25 + $0x8] sm:$0xff] %vm141_vm0, %v153_v13 }
  0xde   : > { %356 = shalt.err (!%p353_p2)
}
  0xdf   : > { %s357_s13 = scalar_lea.hbm %s546_s2, 256  ;;  %s361_s20 = scalar_lea.hbm %s594_s1, 512 }
  0xe0   : > { %p358_p4 = scmp.ne.s32.totalorder %s546_s2, %s357_s13  ;;  %p362_p9 = scmp.lt.u32.totalorder %s546_s2, %s594_s1 }
  0xe1   : > { %p363_p1 = scmp.lt.u32.totalorder %s361_s20, %s357_s13  ;;  %p365_p6 = scmp.lt.u32.totalorder %s357_s13, %s546_s2 }
  0xe2   : > { %p359_p5 = pnand %p358_p4, %p601_p11 }
  0xe3   : > { %p364_p3 = por %p363_p1, %p362_p9 }
  0xe4   : > { %p360_p7 = pneg %p359_p5 }
  0xe5   : > { %p366_p12 = por %p365_p6, %p364_p3 }
  0xe7   : > { %p367_p13 = pnand %p366_p12, %p360_p7 }
  0xe9   : > { %370 = shalt.err (!%p367_p13)
}
  0xea   : > { %s415_s24 = smov 128   ;;  %s416_s26 = smov 8  }
  0xeb   : > { %261 = dma.vmem_to_hbm [thread:$0]  (%p601_p11), %s548_s27, 256, %s546_s2, %s157_s3, %s415_s24, %s415_s24, %s416_s26  }
  0xec PF: > { %s185_s30 = sand.u32 1, %s397_s6   ;;  %p602_p8 = scmp.ne.s32.totalorder %s599_s19, 0 }
  0xed   : > { %p603_p10 = scmp.ge.s32.totalorder %s409_s9, 2  ;;  %s186_s17 = scalar_lea.sflag [#allocation4], %s185_s30 }
  0xef   : > { %p268_p0 = pnand %p603_p10, %p602_p8 }
  0xf1   : > { %392 = dma.done.wait (!%p268_p0), %s186_s17, 256  }
  0xf2   : > { %394 = vsyncadd (!%p268_p0), %s186_s17, 4294967040  ;;  %p14_p2 = scmp.ge.s32.totalorder %s452_s12, 4   ;;  %s604_s6 = smov %s401_s7 }
  0xf3   : > { %s605_s7 = smov %s405_s8  ;;  %s606_s8 = smov %s464_s15 }
  0xf4   : > { %s607_s9 = smov %s452_s12  ;;  %16 = sbr.rel (!%p14_p2) target bundleno = 5 (0x5), region = 69 }
  0xfb   :  { %191 = vsyncpa [#allocation3], 1 }
  0xfc   :  { %193 = vsyncpa [#allocation3 + $0x1], 1 }
  0xfd   :  { %194 = vsyncpa [#allocation4], 1 }
  0xfe   :  { %196 = vsyncpa [#allocation4 + $0x1], 1 }

</bundles_post_ra>
